<compile_context>
chip_gen: v7x
topology: tpu7x:2x2x1
jax: 0.10.0
libtpu: 0.0.40
codegen_flags: <defaults>
</compile_context>

<pallas_src>
import functools

import jax
import jax.numpy as jnp
import numpy as np
from jax.experimental import pallas as pl
from jax.experimental.pallas import tpu as pltpu

# Fixed depthwise filters from MyConv (requires_grad=False constants).
FILTERS = (
    ((-1, -1, -1), (-1, 9, -1), (-1, -1, -1)),   # filter1 (enhancement)
    ((-1, -1, -1), (0, 0, 0), (1, 1, 1)),        # filter2 (prewitt1)
    ((-1, 0, 1), (-1, 0, 1), (-1, 0, 1)),        # filter3 (prewitt2)
    ((-1, -1, 0), (-1, 0, 1), (0, 1, 1)),        # filter4 (prewitt3)
    ((0, 1, 1), (-1, 0, 1), (-1, -1, 0)),        # filter5 (prewitt4)
)

BN_SCALE = 1.0 / (1.0 + 1e-5) ** 0.5  # eval-mode BN, default running stats


@functools.lru_cache(maxsize=None)
def _roll_sign():
    """Pin down pltpu.roll's rotation direction with one tiny probe call so the
    3x3 tap offsets can never be silently mirrored."""
    def probe(x_ref, o_ref):
        o_ref[...] = pltpu.roll(x_ref[...], 1, 1)

    x = jnp.broadcast_to(jnp.arange(128, dtype=jnp.float32), (8, 128))
    y = pl.pallas_call(
        probe, out_shape=jax.ShapeDtypeStruct((8, 128), jnp.float32))(x)
    # jnp.roll-style (out[i] = x[i - shift]) moves lane 0 to lane 1.
    return -1 if float(y[0, 1]) == 0.0 else 1


# ---------------------------------------------------------------------------
# The fused kernel: one grid step processes B samples (grid=(N//B,)).
# ---------------------------------------------------------------------------
def _palmnet_kernel(x_ref, mask_ref,
                    wrgb_ref, wenh_ref, wpre_ref, bbr_ref,
                    wd1_ref, bd1_ref, wd2_ref, bd2_ref,
                    wst_ref, bst_ref, w1_ref, b1_ref, w2_ref, b2_ref,
                    out_ref, *, B, H, W, roll_sign):
    HW = H * W
    L = B * HW                                    # batched lane width
    x = x_ref[...]                                # (3, L) f32, lane-dense

    def tap(a, k):
        """Spatially shifted copy of a (C, L) slab for 3x3 tap k (zero pad).
        Produced one at a time — never 9 live copies."""
        dy, dx = k // 3 - 1, k % 3 - 1
        d = dy * W + dx
        if d == 0:
            return a
        return pltpu.roll(a, (roll_sign * d) % L, 1) * mask_ref[k]

    def fma(acc, wv, t):
        if wv == 0:
            return acc
        if wv == 1:
            return acc + t
        if wv == -1:
            return acc - t
        return acc + float(wv) * t

    # ---- Stage A: single pass over the 9 rgb taps -------------------------
    # Shared by the 5 fixed depthwise filters and the input_rgb (3->1) conv:
    # every rgb tap is rolled exactly once.
    enh = jnp.zeros((3, L), jnp.float32)
    pre = [jnp.zeros((3, L), jnp.float32) for _ in range(4)]
    acc_rgb = jnp.zeros((3, L), jnp.float32)
    for k in range(9):
        t = tap(x, k)
        enh = fma(enh, FILTERS[0][k // 3][k % 3], t)
        for f in range(4):
            pre[f] = fma(pre[f], FILTERS[f + 1][k // 3][k % 3], t)
        acc_rgb = acc_rgb + wrgb_ref[:, k:k + 1] * t          # VPU FMA

    x_rgb = jnp.maximum(jnp.sum(acc_rgb, axis=0, keepdims=True)
                        + bbr_ref[0:1, :], 0.0)               # (1, L)

    # ---- Stage B: input_rgb_enhancement (3->1 conv + BN + ReLU), VPU ------
    acc_enh = jnp.zeros((3, L), jnp.float32)
    for k in range(9):
        acc_enh = acc_enh + wenh_ref[:, k:k + 1] * tap(enh, k)
    x_enh = jnp.maximum(jnp.sum(acc_enh, axis=0, keepdims=True)
                        + bbr_ref[1:2, :], 0.0)               # (1, L)

    # ---- Stage C: prewitt_4cat (12->1 conv + BN + ReLU), VPU --------------
    prewitt = jnp.concatenate(pre, axis=0)                    # (12, L)
    acc_pre = jnp.zeros((12, L), jnp.float32)
    for k in range(9):
        acc_pre = acc_pre + wpre_ref[:, k:k + 1] * tap(prewitt, k)
    x_pre = jnp.maximum(jnp.sum(acc_pre, axis=0, keepdims=True)
                        + bbr_ref[2:3, :], 0.0)               # (1, L)

    # ---- Stage D/E: intput_to_densenet, each conv = ONE K-concat MXU dot --
    cat = jnp.concatenate([x_rgb, x_enh, x_pre, x], axis=0)          # (6, L)
    t1 = jnp.concatenate([tap(cat, k) for k in range(9)], axis=0)    # (54, L)
    y1 = jnp.dot(wd1_ref[...], t1,
                 preferred_element_type=jnp.float32) + bd1_ref[...]  # (6, L)
    t2 = jnp.concatenate([tap(y1, k) for k in range(9)], axis=0)     # (54, L)
    y2 = jnp.maximum(jnp.dot(wd2_ref[...], t2,
                             preferred_element_type=jnp.float32)
                     + bd2_ref[...], 0.0)                            # (3, L)

    # ---- Head: batched, row-major GEMM chain -------------------------------
    # TODO(synk): torchvision densenet161 backbone is not translated; replaced
    # by this global-average-pool + Linear(3->1000, padded to 1024) stub.
    pooled = jnp.sum(y2.reshape(3, B, HW), axis=2) * (1.0 / HW)      # (3, B)
    pooled = pooled.T                                                # (B, 3)
    feat = jnp.dot(pooled, wst_ref[...],
                   preferred_element_type=jnp.float32) + bst_ref[...]   # (B,1024)
    h = jnp.dot(feat.astype(jnp.bfloat16), w1_ref[...],
                preferred_element_type=jnp.float32) + b1_ref[...]       # (B,512)
    h = jnp.maximum(h, 0.0)        # ReLU; Dropout(0.5) is identity in eval
    out_ref[...] = jnp.dot(h, w2_ref[...],
                           preferred_element_type=jnp.float32) + b2_ref[...]


# ---------------------------------------------------------------------------
# Host-side preparation helpers.
# ---------------------------------------------------------------------------
def _tap_masks(H, W, B):
    """(9, 1, B*H*W) {0,1} masks zeroing lanes whose 3x3 tap falls off the
    image, pre-tiled to the batched lane width (sample borders included)."""
    hh = np.arange(H * W) // W
    ww = np.arange(H * W) % W
    m = np.zeros((9, 1, H * W), np.float32)
    for k in range(9):
        dy, dx = k // 3 - 1, k % 3 - 1
        m[k, 0] = ((hh + dy >= 0) & (hh + dy < H) &
                   (ww + dx >= 0) & (ww + dx < W)).astype(np.float32)
    return jnp.asarray(np.tile(m, (1, 1, B)))


def _fold_cols(w, b, bn):
    """Cout=1 conv -> (Cin, 9) per-tap weight columns + (1,1) bias (BN folded)
    for the VPU multiply-add path."""
    if bn:
        w = w * BN_SCALE
        b = b * BN_SCALE
    cin = w.shape[1]
    return w.reshape(cin, 9), b.reshape(1, 1)


def _fold_mat(w, b, bn):
    """Conv -> (Cout, 9*Cin) K-concat weight + (Cout, 1) bias (BN folded) for
    the single-dot MXU path.  Column k*Cin+cin matches tap-major K-concat."""
    if bn:
        w = w * BN_SCALE
        b = b * BN_SCALE
    cout, cin = w.shape[0], w.shape[1]
    wm = jnp.transpose(w, (0, 2, 3, 1)).reshape(cout, 9 * cin)
    return wm, b.reshape(cout, 1)


def _full(a):
    """Whole-array VMEM block, resident across the batch grid."""
    zeros = (0,) * a.ndim
    return pl.BlockSpec(a.shape, lambda n, _z=zeros: _z)


def palmnet_forward(rgb, params, *, block_b=None):
    N, C, H, W = rgb.shape
    assert C == 3
    HW = H * W

    # Per-step batch B.  Default 64 keeps VMEM well inside the 32 MiB scoped
    # default (and v7x's 64 MiB physical); for peak MXU utilisation on the
    # head GEMM pass block_b=128 (v5e) / 256 (v6e, v7x) and raise
    # vmem_limit_bytes accordingly.
    if block_b is None:
        block_b = N if N <= 64 else 64
    nblk = pl.cdiv(N, block_b)
    Np = nblk * block_b
    assert nblk == 1 or ((block_b * HW) % 128 == 0 and block_b % 8 == 0)

    # Lane-dense layout: (C, N*HW) with lane index b*HW + h*W + w.
    x = rgb.reshape(N, C, HW)
    if Np != N:
        x = jnp.concatenate([x, jnp.zeros((Np - N, C, HW), x.dtype)], axis=0)
    x = jnp.transpose(x, (1, 0, 2)).reshape(C, Np * HW)

    L = block_b * HW
    masks = _tap_masks(H, W, block_b)

    wrgb, brgb = _fold_cols(*params["input_rgb"], bn=True)
    wenh, benh = _fold_cols(*params["input_rgb_enh"], bn=True)
    wpre, bpre = _fold_cols(*params["prewitt_4cat"], bn=True)
    bbr = jnp.concatenate([brgb, benh, bpre], axis=0)          # (3, 1)
    wd1, bd1 = _fold_mat(*params["to_dense_1"], bn=False)      # (6, 54)
    wd2, bd2 = _fold_mat(*params["to_dense_2"], bn=True)       # (3, 54)

    # Head weights: row-major, zero-pad 1000 -> 1024 lanes; the 2 MB outLayer1
    # matrix is carried as bf16 (f32 accumulation on the MXU; padding exact).
    wst, bst = params["densenet_stub"]     # (3, 1000), (1, 1000)
    w1, b1 = params["outLayer1"]           # (1000, 512), (1, 512)
    w2, b2 = params["outLayer2"]           # (512, 19), (1, 19)
    KP = 1024
    wst_p = jnp.zeros((3, KP), jnp.float32).at[:, :1000].set(wst)
    bst_p = jnp.zeros((1, KP), jnp.float32).at[:, :1000].set(bst)
    w1_p = jnp.zeros((KP, 512), jnp.float32).at[:1000].set(w1).astype(jnp.bfloat16)

    ops = [x, masks,
           wrgb, wenh, wpre, bbr,
           wd1, bd1, wd2, bd2,
           wst_p, bst_p, w1_p, b1, w2, b2]
    in_specs = ([pl.BlockSpec((C, L), lambda n: (0, n))]
                + [_full(a) for a in ops[1:]])

    kern = functools.partial(_palmnet_kernel, B=block_b, H=H, W=W,
                             roll_sign=_roll_sign())

    out = pl.pallas_call(
        kern,
        out_shape=jax.ShapeDtypeStruct((Np, 19), jnp.float32),
        grid=(nblk,),
        in_specs=in_specs,
        out_specs=pl.BlockSpec((block_b, 19), lambda n: (n, 0)),
        compiler_params=pltpu.CompilerParams(
            dimension_semantics=("parallel",)),   # megacore split over blocks
    )(*ops)
    return out[:N]


# ---------------------------------------------------------------------------
# Deterministic parameter init (PyTorch-default-like uniform bounds).
# ---------------------------------------------------------------------------
def _init_conv(key, cout, cin):
    bound = 1.0 / (cin * 9) ** 0.5
    kw, kb = jax.random.split(key)
    w = jax.random.uniform(kw, (cout, cin, 3, 3), jnp.float32, -bound, bound)
    b = jax.random.uniform(kb, (cout,), jnp.float32, -bound, bound)
    return w, b


def _init_linear(key, fin, fout):
    bound = 1.0 / fin ** 0.5
    kw, kb = jax.random.split(key)
    w = jax.random.uniform(kw, (fin, fout), jnp.float32, -bound, bound)
    b = jax.random.uniform(kb, (1, fout), jnp.float32, -bound, bound)
    return w, b


def init_params(key):
    ks = jax.random.split(key, 8)
    return {
        "input_rgb": _init_conv(ks[0], 1, 3),
        "input_rgb_enh": _init_conv(ks[1], 1, 3),
        "prewitt_4cat": _init_conv(ks[2], 1, 12),
        "to_dense_1": _init_conv(ks[3], 6, 6),
        "to_dense_2": _init_conv(ks[4], 3, 6),
        "densenet_stub": _init_linear(ks[5], 3, 1000),
        "outLayer1": _init_linear(ks[6], 1000, 512),
        "outLayer2": _init_linear(ks[7], 512, 19),
    }


if __name__ == "__main__":
    key = jax.random.PRNGKey(0)
    k_in, k_par = jax.random.split(key)
    rgb = jax.random.normal(k_in, (2, 3, 16, 16), dtype=jnp.float32)
    params = init_params(k_par)

    out = jax.block_until_ready(palmnet_forward(rgb, params))
    assert out.shape == (2, 19), out.shape
    assert out.dtype == jnp.float32
    print("KERNEL_OK")
</pallas_src>

<mosaic_0001>
module attributes {stable_mosaic.version = 11 : i64} {
  func.func @probe(%arg0: memref<8x128xf32, #tpu.memory_space<vmem>>, %arg1: memref<8x128xf32, #tpu.memory_space<vmem>>) attributes {dimension_semantics = [], scalar_prefetch = 0 : i64, scratch_operands = 0 : i64, tpu.core_type = #tpu.core_type<tc>} {
    %c0 = arith.constant 0 : index
    %c0_0 = arith.constant 0 : index
    %0 = vector.load %arg0[%c0, %c0_0] : memref<8x128xf32, #tpu.memory_space<vmem>>, vector<8x128xf32>
    %c1_i32 = arith.constant 1 : i32
    %1 = tpu.dynamic_rotate %0 by %c1_i32 dim 1 : vector<8x128xf32>, i32 -> vector<8x128xf32>
    %c0_1 = arith.constant 0 : index
    %c0_2 = arith.constant 0 : index
    %2 = vector.load %arg1[%c0_1, %c0_2] : memref<8x128xf32, #tpu.memory_space<vmem>>, vector<8x128xf32>
    tpu.vector_store %arg1[%c0_1, %c0_2], %1 {strides = array<i32>} : memref<8x128xf32, #tpu.memory_space<vmem>>, vector<8x128xf32>,
    return
  }
}

</mosaic_0001>

<bundles_post_ra>
// kernel: tpu_custom_call.1
= control target key start
LH: loop header
LB: loop body
LE: loop exit
PB: predicated region body
PF: predicated region fallthrough
CT: control target
= control target key end

     0   :  { %6 = vsyncpa [#allocation3], 0  ;;  %s128_s0 = inlined_call_operand.hbm [shape: f32[8,128], index: 0, kind: input, shape index: {}]   ;;  %s129_s1 = inlined_call_operand.hbm [shape: f32[8,128], index: 1, kind: output, shape index: {}]  }
   0x1   :  { %7 = vsyncpa [#allocation4], 0  ;;  %s91_s6 = smov [#allocation2]   ;;  %s43_s10 = scalar_lea.hbm %s128_s0, 128 }
   0x2   :  { %s14_s7 = sshll.u32 %s91_s6, 4  ;;  %p44_p0 = scmp.ne.s32.totalorder %s128_s0, %s43_s10  ;;  %s15_s7 = int_to_ptr.vmem [resolvable:$true] %s14_s7 }
   0x3   :  { %p47_p1 = scmp.lt.u32.totalorder %s43_s10, %s128_s0 }
   0x5   :  { %p49_p2 = pnand %p47_p1, %p44_p0 }
   0x7   :  { %52 = shalt.err (!%p49_p2)
}
   0x8   :  { %s53_s15 = scalar_lea.vmem %s15_s7, 128  ;;  %p58_p4 = scmp.lt.s32.totalorder %s15_s7, %s15_s7 }
   0x9   :  { %p54_p3 = scmp.ne.s32.totalorder %s15_s7, %s53_s15  ;;  %p59_p5 = scmp.lt.s32.totalorder %s53_s15, %s53_s15 }
   0xb   :  { %p60_p6 = por %p59_p5, %p58_p4 }
   0xd   :  { %p61_p7 = pnand %p60_p6, %p54_p3 }
   0xf   :  { %64 = shalt.err (!%p61_p7)
}
  0x10   :  { %17 = dma.hbm_to_vmem [thread:$0]  %s128_s0, 128, %s15_s7, [#allocation3]  }
  0x11   :  { %87 = dma.done.wait [#allocation3], 128  }
  0x12   :  { %88 = vsyncadd [#allocation3], 4294967168  ;;  %v21_v0 = vld [vmem:[#allocation2] sm:$0xff]  ;;  %s92_s18 = smov 1   ;;  %s93_s19 = smov [#allocation5]  }
  0x13   :  { %22 = vrot.lane.b32.xlu0 %v21_v0, %s92_s18  ;;  %s31_s20 = sshll.u32 %s93_s19, 4  ;;  %s32_s20 = int_to_ptr.vmem [resolvable:$true] %s31_s20 }
  0x14   :  { %s65_s21 = scalar_lea.vmem %s32_s20, 128  ;;  %p70_p9 = scmp.lt.s32.totalorder %s32_s20, %s32_s20 }
  0x15   :  { %p66_p8 = scmp.ne.s32.totalorder %s32_s20, %s65_s21  ;;  %p71_p10 = scmp.lt.s32.totalorder %s65_s21, %s65_s21 }
  0x17   :  { %p72_p11 = por %p71_p10, %p70_p9 }
  0x19   :  { %p73_p12 = pnand %p72_p11, %p66_p8 }
  0x85   :  { %v23_v1 = vpop.permute.xlu0 %22 }
  0x86   :  { %24 = vst [vmem:[#allocation5] sm:$0xff] %v23_v1 }
  0x87   :  { %76 = shalt.err (!%p73_p12)
}
  0x88   :  { %s77_s0 = scalar_lea.hbm %s129_s1, 128 }
  0x89   :  { %p78_p13 = scmp.ne.s32.totalorder %s129_s1, %s77_s0  ;;  %p81_p0 = scmp.lt.u32.totalorder %s77_s0, %s129_s1 }
  0x8b   :  { %p83_p1 = pnand %p81_p0, %p78_p13 }
  0x8d   :  { %86 = shalt.err (!%p83_p1)
}
  0x8e   :  { %34 = dma.vmem_to_hbm [thread:$0]  %s32_s20, 128, %s129_s1, [#allocation4]  }
  0x8f   :  { %89 = dma.done.wait [#allocation4], 128  }
  0x90   :  { %90 = vsyncadd [#allocation4], 4294967168 }
  0x91   :  { %38 = vsyncpa [#allocation3], 1 }
  0x92   :  { %39 = vsyncpa [#allocation4], 1 }

</bundles_post_ra>
